<compile_context>
chip_gen: v7x
topology: tpu7x:2x2x1
jax: 0.10.0
libtpu: 0.0.40
codegen_flags: <defaults>
</compile_context>

<pallas_src>
import jax
import jax.numpy as jnp
from jax.experimental import pallas as pl
from jax.experimental.pallas import tpu as pltpu


_GELU_C = 0.7978845608028654  # sqrt(2/pi), hoisted constant


def _gelu_new(x):
    # 0.5*x*(1+tanh(sqrt(2/pi)*(x + 0.044715*x^3))), cubic fused as
    # x*(1 + 0.044715*x*x) to save one VPU multiply.
    inner = _GELU_C * x * (1.0 + 0.044715 * (x * x))
    return 0.5 * x * (1.0 + jnp.tanh(inner))


def _round_up(a, b):
    return ((a + b - 1) // b) * b


# ---------------------------------------------------------------------------
# Kernels
# ---------------------------------------------------------------------------
def mlp_resident_kernel(x_ref, wfc_ref, bfc_ref, wproj_ref, bproj_ref, o_ref):
    # x_ref: (block_m, nx_p) tile.  Weights/biases are full, VMEM-resident.
    h = jnp.dot(x_ref[...], wfc_ref[...], preferred_element_type=jnp.float32)
    h = _gelu_new(h + bfc_ref[...].astype(jnp.float32))
    out = jnp.dot(h.astype(wproj_ref.dtype), wproj_ref[...],
                  preferred_element_type=jnp.float32)
    # TODO(synk): training-mode dropout (resid_pdrop) not implemented;
    # eval-mode dropout == identity.
    o_ref[...] = (out + bproj_ref[...].astype(jnp.float32)).astype(o_ref.dtype)


def mlp_tiled_kernel(x_ref, wfc_ref, bfc_ref, wproj_ref, bproj_ref, o_ref,
                     acc_ref):
    # Fallback when weights don't fit VMEM: reduce over n_state in k-chunks.
    # x_ref:     (block_m, nx_p)
    # wfc_ref:   (nx_p, block_k)     bfc_ref:   (1, block_k)
    # wproj_ref: (block_k, nx_p)     bproj_ref: (1, nx_p)
    # o_ref:     (block_m, nx_p)     acc_ref:   (block_m, nx_p) f32 scratch
    k = pl.program_id(1)

    @pl.when(k == 0)
    def _():
        # Seed the accumulator with the projection bias (saves an epilogue add).
        acc_ref[...] = jnp.zeros_like(acc_ref) + bproj_ref[...].astype(jnp.float32)

    h = jnp.dot(x_ref[...], wfc_ref[...], preferred_element_type=jnp.float32)
    h = _gelu_new(h + bfc_ref[...].astype(jnp.float32))
    acc_ref[...] += jnp.dot(h.astype(wproj_ref.dtype), wproj_ref[...],
                            preferred_element_type=jnp.float32)

    @pl.when(k == pl.num_programs(1) - 1)
    def _():
        o_ref[...] = acc_ref[...].astype(o_ref.dtype)


# ---------------------------------------------------------------------------
# Tiling / budget selection
# ---------------------------------------------------------------------------
def _vmem_budget_bytes():
    phys = 64 << 20  # conservative fallback (v7x per-TC physical VMEM)
    try:
        info = pltpu.get_tpu_info()
        cap = getattr(info, "vmem_capacity_bytes", None)
        if cap:
            phys = int(cap)
    except Exception:
        pass
    # Never request all of physical VMEM; leave compiler-internal headroom.
    return max(min(phys * 3 // 4, 100 << 20), 24 << 20)


def _choose_tiling(M, nx_p, ns_p, x_item, w_item, out_item, budget):
    """Returns (resident_weights, block_m, block_k, vmem_estimate_bytes)."""
    headroom = 6 << 20

    if M <= 1024:
        if M > 256:
            # Two row tiles so both TensorCores (v7x) have work.
            bm_candidates = [_round_up(-(-M // 2), 128)]
        else:
            bm_candidates = [_round_up(max(M, 8), 128)]
    else:
        bm_candidates = [1024, 768, 512, 256]

    def per_row(bk_lane):
        # x + out tiles (double-buffered) + f32 intermediates (h row, out row).
        return (2 * nx_p * x_item + 2 * nx_p * out_item
                + bk_lane * 4 + nx_p * 4)

    # Preferred: both weight matrices fully resident in VMEM, no k grid.
    w_resident = (2 * nx_p * ns_p + nx_p + ns_p) * w_item
    for bm in bm_candidates:
        est = w_resident + bm * per_row(ns_p) + headroom
        if est <= budget:
            return True, bm, ns_p, est

    # Fallback: tile the n_state reduction; weight k-chunks double-buffered.
    for bm in bm_candidates:
        for bk in (2048, 1024, 512, 256):
            bk = min(bk, ns_p)
            w_tiles = (2 * (nx_p * bk + bk * nx_p) + 2 * (bk + nx_p)) * w_item
            est = w_tiles + bm * (per_row(bk) + nx_p * 4) + headroom
            if est <= budget:
                return False, bm, bk, est

    # Last resort: smallest tiles considered.
    return False, bm_candidates[-1], min(256, ns_p), budget


# ---------------------------------------------------------------------------
# Wrapper
# ---------------------------------------------------------------------------
def mlp_forward(x, w_fc, b_fc, w_proj, b_proj):
    """x: [B, S, nx] -> [B, S, nx]."""
    B, S, nx = x.shape
    nx_in, n_state = w_fc.shape
    assert nx_in == nx and w_proj.shape == (n_state, nx)
    M = B * S

    x_item = jnp.dtype(x.dtype).itemsize
    w_item = jnp.dtype(w_fc.dtype).itemsize
    out_item = x_item

    nx_p = _round_up(nx, 128)        # lane-dense x / output slab
    ns_p = _round_up(n_state, 128)

    budget = _vmem_budget_bytes()
    resident, block_m, block_k, est = _choose_tiling(
        M, nx_p, ns_p, x_item, w_item, out_item, budget)

    if not resident:
        ns_p = _round_up(n_state, block_k)   # reduction tile must divide ns_p

    M_p = _round_up(M, block_m)

    # --- pad only when actually needed (standard GPT-2 dims: no-op) ---------
    # TODO(synk): in a real model, weight padding (nx or n_state not
    # 128-aligned) should be hoisted to parameter-load time.
    x2d = x.reshape(M, nx)
    if (M_p, nx_p) != (M, nx):
        x2d = jnp.zeros((M_p, nx_p), x.dtype).at[:M, :nx].set(x2d)
    wfc = w_fc
    if (nx_p, ns_p) != (nx, n_state):
        wfc = jnp.zeros((nx_p, ns_p), w_fc.dtype).at[:nx, :n_state].set(w_fc)
    bfc = b_fc.reshape(1, n_state)
    if ns_p != n_state:
        bfc = jnp.zeros((1, ns_p), b_fc.dtype).at[:, :n_state].set(bfc)
    wproj = w_proj
    if (ns_p, nx_p) != (n_state, nx):
        wproj = jnp.zeros((ns_p, nx_p), w_proj.dtype).at[:n_state, :nx].set(w_proj)
    bproj = b_proj.reshape(1, nx)
    if nx_p != nx:
        bproj = jnp.zeros((1, nx_p), b_proj.dtype).at[:, :nx].set(bproj)

    vmem_limit = int(max(min(est + (8 << 20), budget), min(32 << 20, budget)))

    cost = pl.CostEstimate(
        flops=4 * M * nx * n_state,                 # two matmuls
        transcendentals=M * n_state,                # tanh
        bytes_accessed=(2 * M * nx * x_item
                        + 2 * nx * n_state * w_item
                        + (nx + n_state) * w_item),
    )

    if resident:
        grid = (M_p // block_m,)
        vmem_full = pl.BlockSpec(memory_space=pltpu.MemorySpace.VMEM)
        grid_spec = pltpu.PrefetchScalarGridSpec(
            num_scalar_prefetch=0,
            grid=grid,
            in_specs=[
                pl.BlockSpec((block_m, nx_p), lambda i: (i, 0)),   # x row tile
                vmem_full,   # W_fc   (whole, single-buffered, loaded once)
                vmem_full,   # b_fc
                vmem_full,   # W_proj
                vmem_full,   # b_proj
            ],
            out_specs=pl.BlockSpec((block_m, nx_p), lambda i: (i, 0)),
        )
        kernel = mlp_resident_kernel
        dim_sem = ("parallel",)
    else:
        grid = (M_p // block_m, ns_p // block_k)
        grid_spec = pltpu.PrefetchScalarGridSpec(
            num_scalar_prefetch=0,
            grid=grid,
            in_specs=[
                pl.BlockSpec((block_m, nx_p), lambda i, k: (i, 0)),   # x rows
                pl.BlockSpec((nx_p, block_k), lambda i, k: (0, k)),   # W_fc chunk
                pl.BlockSpec((1, block_k), lambda i, k: (0, k)),      # b_fc chunk
                pl.BlockSpec((block_k, nx_p), lambda i, k: (k, 0)),   # W_proj chunk
                pl.BlockSpec((1, nx_p), lambda i, k: (0, 0)),         # b_proj
            ],
            out_specs=pl.BlockSpec((block_m, nx_p), lambda i, k: (i, 0)),
            scratch_shapes=[pltpu.VMEM((block_m, nx_p), jnp.float32)],
        )
        kernel = mlp_tiled_kernel
        dim_sem = ("parallel", "arbitrary")

    out = pl.pallas_call(
        kernel,
        out_shape=jax.ShapeDtypeStruct((M_p, nx_p), x.dtype),
        grid_spec=grid_spec,
        compiler_params=pltpu.CompilerParams(
            dimension_semantics=dim_sem,
            vmem_limit_bytes=vmem_limit,
        ),
        cost_estimate=cost,
    )(x2d, wfc, bfc, wproj, bproj)

    if (M_p, nx_p) != (M, nx):
        out = out[:M, :nx]
    return out.reshape(B, S, nx)


def mlp_reference(x, w_fc, b_fc, w_proj, b_proj):
    h = jnp.einsum("bsn,nk->bsk", x.astype(jnp.float32),
                   w_fc.astype(jnp.float32)) + b_fc.astype(jnp.float32)
    h = _gelu_new(h)
    h2 = jnp.einsum("bsk,kn->bsn", h,
                    w_proj.astype(jnp.float32)) + b_proj.astype(jnp.float32)
    return h2.astype(x.dtype)


if __name__ == "__main__":
    # Small shapes consistent with the module: n_embd=32, n_state=4*n_embd=128.
    B, S, nx = 2, 8, 32
    n_state = 4 * nx

    key = jax.random.PRNGKey(0)
    kx, kw1, kw2 = jax.random.split(key, 3)

    x = jax.random.normal(kx, (B, S, nx), dtype=jnp.float32)
    # Conv1D init: weight ~ N(0, 0.02), bias zeros.
    w_fc = 0.02 * jax.random.normal(kw1, (nx, n_state), dtype=jnp.float32)
    b_fc = jnp.zeros((n_state,), dtype=jnp.float32)
    w_proj = 0.02 * jax.random.normal(kw2, (n_state, nx), dtype=jnp.float32)
    b_proj = jnp.zeros((nx,), dtype=jnp.float32)

    out = jax.block_until_ready(mlp_forward(x, w_fc, b_fc, w_proj, b_proj))
    ref = mlp_reference(x, w_fc, b_fc, w_proj, b_proj)

    assert out.shape == (B, S, nx)
    err = float(jnp.max(jnp.abs(out - ref)))
    assert jnp.allclose(out, ref, atol=1e-5, rtol=1e-5), err
    print("KERNEL_OK")
</pallas_src>

<mosaic_0001>
module attributes {stable_mosaic.version = 11 : i64} {
  func.func @mlp_resident_kernel(%arg0: i32, %arg1: memref<128x128xf32, #tpu.memory_space<vmem>>, %arg2: memref<128x128xf32, #tpu.memory_space<vmem>>, %arg3: memref<1x128xf32, #tpu.memory_space<vmem>>, %arg4: memref<128x128xf32, #tpu.memory_space<vmem>>, %arg5: memref<1x128xf32, #tpu.memory_space<vmem>>, %arg6: memref<128x128xf32, #tpu.memory_space<vmem>>) attributes {dimension_semantics = [#tpu.dimension_semantics<parallel>], iteration_bounds = array<i64: 1>, scalar_prefetch = 0 : i64, scratch_operands = 0 : i64, tpu.core_type = #tpu.core_type<tc>, window_params = [{transform_indices = @transform_0, window_bounds = array<i64: 128, 128>}, {pipeline_mode = #tpu.pipeline_mode<synchronous>, transform_indices = @transform_1, window_bounds = array<i64: 128, 128>}, {pipeline_mode = #tpu.pipeline_mode<synchronous>, transform_indices = @transform_2, window_bounds = array<i64: 1, 128>}, {pipeline_mode = #tpu.pipeline_mode<synchronous>, transform_indices = @transform_3, window_bounds = array<i64: 128, 128>}, {pipeline_mode = #tpu.pipeline_mode<synchronous>, transform_indices = @transform_4, window_bounds = array<i64: 1, 128>}, {transform_indices = @transform_5, window_bounds = array<i64: 128, 128>}]} {
    %c0 = arith.constant 0 : index
    %c0_0 = arith.constant 0 : index
    %0 = vector.load %arg1[%c0, %c0_0] : memref<128x128xf32, #tpu.memory_space<vmem>>, vector<128x128xf32>
    %c0_1 = arith.constant 0 : index
    %c0_2 = arith.constant 0 : index
    %1 = vector.load %arg2[%c0_1, %c0_2] : memref<128x128xf32, #tpu.memory_space<vmem>>, vector<128x128xf32>
    %cst = arith.constant dense<0.000000e+00> : vector<128x128xf32>
    %2 = tpu.matmul %0, %1, %cst {dimension_numbers = #tpu.dot_dimension_numbers<[1], [0], [0], [1], [0, 0, 1, 1], [], []>} : vector<128x128xf32>, vector<128x128xf32>, vector<128x128xf32> -> vector<128x128xf32>
    %c0_3 = arith.constant 0 : index
    %c0_4 = arith.constant 0 : index
    %3 = vector.load %arg3[%c0_3, %c0_4] : memref<1x128xf32, #tpu.memory_space<vmem>>, vector<1x128xf32>
    %4 = vector.broadcast %3 : vector<1x128xf32> to vector<128x128xf32>
    %5 = arith.addf %2, %4 : vector<128x128xf32>
    %cst_5 = arith.constant 0.797884583 : f32
    %6 = vector.broadcast %cst_5 : f32 to vector<128x128xf32>
    %7 = arith.mulf %6, %5 : vector<128x128xf32>
    %8 = arith.mulf %5, %5 : vector<128x128xf32>
    %cst_6 = arith.constant 4.471500e-02 : f32
    %9 = vector.broadcast %cst_6 : f32 to vector<128x128xf32>
    %10 = arith.mulf %9, %8 : vector<128x128xf32>
    %cst_7 = arith.constant 1.000000e+00 : f32
    %11 = vector.broadcast %cst_7 : f32 to vector<128x128xf32>
    %12 = arith.addf %11, %10 : vector<128x128xf32>
    %13 = arith.mulf %7, %12 : vector<128x128xf32>
    %cst_8 = arith.constant 5.000000e-01 : f32
    %14 = vector.broadcast %cst_8 : f32 to vector<128x128xf32>
    %15 = arith.mulf %14, %5 : vector<128x128xf32>
    %16 = math.tanh %13 : vector<128x128xf32>
    %cst_9 = arith.constant 1.000000e+00 : f32
    %17 = vector.broadcast %cst_9 : f32 to vector<128x128xf32>
    %18 = arith.addf %17, %16 : vector<128x128xf32>
    %19 = arith.mulf %15, %18 : vector<128x128xf32>
    %c0_10 = arith.constant 0 : index
    %c0_11 = arith.constant 0 : index
    %20 = vector.load %arg4[%c0_10, %c0_11] : memref<128x128xf32, #tpu.memory_space<vmem>>, vector<128x128xf32>
    %cst_12 = arith.constant dense<0.000000e+00> : vector<128x128xf32>
    %21 = tpu.matmul %19, %20, %cst_12 {dimension_numbers = #tpu.dot_dimension_numbers<[1], [0], [0], [1], [0, 0, 1, 1], [], []>} : vector<128x128xf32>, vector<128x128xf32>, vector<128x128xf32> -> vector<128x128xf32>
    %c0_13 = arith.constant 0 : index
    %c0_14 = arith.constant 0 : index
    %22 = vector.load %arg5[%c0_13, %c0_14] : memref<1x128xf32, #tpu.memory_space<vmem>>, vector<1x128xf32>
    %23 = vector.broadcast %22 : vector<1x128xf32> to vector<128x128xf32>
    %24 = arith.addf %21, %23 : vector<128x128xf32>
    %c0_15 = arith.constant 0 : index
    %c0_16 = arith.constant 0 : index
    %25 = vector.load %arg6[%c0_15, %c0_16] : memref<128x128xf32, #tpu.memory_space<vmem>>, vector<128x128xf32>
    tpu.vector_store %arg6[%c0_15, %c0_16], %24 {strides = array<i32>} : memref<128x128xf32, #tpu.memory_space<vmem>>, vector<128x128xf32>,
    return
  }
  func.func @transform_0(%arg0: i32) -> (i32, i32) {
    %c0_i32 = arith.constant 0 : i32
    %c0_i32_0 = arith.constant 0 : i32
    return %arg0, %c0_i32 : i32, i32
  }
  func.func @transform_1(%arg0: i32) -> (i32, i32) {
    %c0_i32 = arith.constant 0 : i32
    %c0_i32_0 = arith.constant 0 : i32
    %c0_i32_1 = arith.constant 0 : i32
    return %c0_i32, %c0_i32_0 : i32, i32
  }
  func.func @transform_2(%arg0: i32) -> (i32, i32) {
    %c0_i32 = arith.constant 0 : i32
    %c0_i32_0 = arith.constant 0 : i32
    %c0_i32_1 = arith.constant 0 : i32
    return %c0_i32, %c0_i32_0 : i32, i32
  }
  func.func @transform_3(%arg0: i32) -> (i32, i32) {
    %c0_i32 = arith.constant 0 : i32
    %c0_i32_0 = arith.constant 0 : i32
    %c0_i32_1 = arith.constant 0 : i32
    return %c0_i32, %c0_i32_0 : i32, i32
  }
  func.func @transform_4(%arg0: i32) -> (i32, i32) {
    %c0_i32 = arith.constant 0 : i32
    %c0_i32_0 = arith.constant 0 : i32
    %c0_i32_1 = arith.constant 0 : i32
    return %c0_i32, %c0_i32_0 : i32, i32
  }
  func.func @transform_5(%arg0: i32) -> (i32, i32) {
    %c0_i32 = arith.constant 0 : i32
    %c0_i32_0 = arith.constant 0 : i32
    return %arg0, %c0_i32 : i32, i32
  }
}

</mosaic_0001>

<bundles_post_ra>
// kernel: tpu_custom_call.1
= control target key start
LH: loop header
LB: loop body
LE: loop exit
PB: predicated region body
PF: predicated region fallthrough
CT: control target
= control target key end

     0   :  { %10 = vsyncpa [#allocation3], 0  ;;  %s1186_s0 = inlined_call_operand.hbm [shape: f32[128,128], index: 0, kind: input, shape index: {}]   ;;  %s1187_s1 = inlined_call_operand.hbm [shape: f32[128,128], index: 1, kind: input, shape index: {}]   ;;  %s1188_s2 = inlined_call_operand.vmem [shape: f32[1,128], index: 2, kind: input, shape index: {}]   ;;  %s1189_s3 = inlined_call_operand.hbm [shape: f32[128,128], index: 3, kind: input, shape index: {}]   ;;  %s1190_s4 = inlined_call_operand.vmem [shape: f32[1,128], index: 4, kind: input, shape index: {}]   ;;  %s1191_s5 = inlined_call_operand.hbm [shape: f32[128,128], index: 5, kind: output, shape index: {}]  }
   0x1   :  { %11 = vsyncpa [#allocation6], 0 }
   0x2   :  { %12 = vsyncpa [#allocation4], 0  ;;  %s966_s18 = smov [#allocation5]   ;;  %s967_s20 = smov [#allocation2]  }
   0x3   :  { %s30_s19 = sshll.u32 %s966_s18, 4  ;;  %s18_s21 = sshll.u32 %s967_s20, 4  ;;  %s31_s19 = int_to_ptr.vmem [resolvable:$true] %s30_s19  ;;  %s1002_s21 = int_to_ptr.vmem [resolvable:$true] %s18_s21 }
   0x4   :  { %s872_s24 = scalar_lea.hbm %s1187_s1, 2048 }
   0x5   :  { %p873_p0 = scmp.ne.s32.totalorder %s1187_s1, %s872_s24  ;;  %p876_p1 = scmp.lt.u32.totalorder %s872_s24, %s1187_s1 }
   0x7   :  { %p878_p2 = pnand %p876_p1, %p873_p0 }
   0x9   :  { %881 = shalt.err (!%p878_p2)
}
   0xa   :  { %s882_s29 = scalar_lea.vmem %s31_s19, 2048  ;;  %p887_p4 = scmp.lt.s32.totalorder %s31_s19, %s31_s19 }
   0xb   :  { %p883_p3 = scmp.ne.s32.totalorder %s31_s19, %s882_s29  ;;  %p888_p5 = scmp.lt.s32.totalorder %s882_s29, %s882_s29 }
   0xd   :  { %p889_p6 = por %p888_p5, %p887_p4 }
   0xf   :  { %p890_p7 = pnand %p889_p6, %p883_p3 }
  0x11   :  { %893 = shalt.err (!%p890_p7)
}
  0x12   :  { %s968_s30 = smov 128   ;;  %s969_s6 = smov 8  }
  0x13   :  { %36 = dma.hbm_to_vmem [thread:$0]  %s1187_s1, 2048, %s31_s19, [#allocation6], %s968_s30, %s968_s30, %s969_s6  }
  0x14   :  { %s894_s11 = scalar_lea.hbm %s1186_s0, 2048 }
  0x15   :  { %p895_p8 = scmp.ne.s32.totalorder %s1186_s0, %s894_s11  ;;  %p898_p9 = scmp.lt.u32.totalorder %s894_s11, %s1186_s0 }
  0x17   :  { %p900_p10 = pnand %p898_p9, %p895_p8 }
  0x19   :  { %903 = shalt.err (!%p900_p10)
}
  0x1a   :  { %s904_s16 = scalar_lea.vmem %s1002_s21, 2048  ;;  %p909_p12 = scmp.lt.s32.totalorder %s1002_s21, %s1002_s21 }
  0x1b   :  { %p905_p11 = scmp.ne.s32.totalorder %s1002_s21, %s904_s16  ;;  %p910_p13 = scmp.lt.s32.totalorder %s904_s16, %s904_s16 }
  0x1d   :  { %p911_p0 = por %p910_p13, %p909_p12 }
  0x1f   :  { %p912_p1 = pnand %p911_p0, %p905_p11 }
  0x21   :  { %915 = shalt.err (!%p912_p1)
}
  0x22   :  { %24 = dma.hbm_to_vmem [thread:$0]  %s1186_s0, 2048, %s1002_s21, [#allocation3], %s968_s30, %s968_s30, %s969_s6  }
  0x23   :  { %s970_s18 = smov [#allocation7]   ;;  %s916_s23 = scalar_lea.hbm %s1189_s3, 2048 }
  0x24   :  { %s44_s19 = sshll.u32 %s970_s18, 4  ;;  %p917_p2 = scmp.ne.s32.totalorder %s1189_s3, %s916_s23  ;;  %s45_s19 = int_to_ptr.vmem [resolvable:$true] %s44_s19 }
  0x25   :  { %p920_p3 = scmp.lt.u32.totalorder %s916_s23, %s1189_s3 }
  0x27   :  { %p922_p4 = pnand %p920_p3, %p917_p2 }
  0x29   :  { %925 = shalt.err (!%p922_p4)
}
  0x2a   :  { %s926_s28 = scalar_lea.vmem %s45_s19, 2048  ;;  %p931_p6 = scmp.lt.s32.totalorder %s45_s19, %s45_s19 }
  0x2b   :  { %p927_p5 = scmp.ne.s32.totalorder %s45_s19, %s926_s28  ;;  %p932_p7 = scmp.lt.s32.totalorder %s926_s28, %s926_s28 }
  0x2d   :  { %p933_p8 = por %p932_p7, %p931_p6 }
  0x2f   :  { %p934_p9 = pnand %p933_p8, %p927_p5 }
  0x31   :  { %937 = shalt.err (!%p934_p9)
}
  0x32   :  { %50 = dma.hbm_to_vmem [thread:$0]  %s1189_s3, 2048, %s45_s19, [#allocation6], %s968_s30, %s968_s30, %s969_s6  }
  0x33   :  { %960 = dma.done.wait [#allocation3], 2048  }
  0x34   :  { %961 = vsyncadd [#allocation3], 4294965248 }
  0x35   :  { %962 = dma.done.wait [#allocation6], 4096  }
  0x36   :  { %963 = vsyncadd [#allocation6], 4294963200  ;;  %v78_v0 = vld [vmem:[#allocation5] sm:$0xff]  ;;  %v79_v1 = vld [vmem:[#allocation5 + $0x8] sm:$0xff] }
  0x37   :  { %v80_v2 = vld [vmem:[#allocation5 + $0x10] sm:$0xff]  ;;  %v770_v3 = vpack.c.bf16 %v79_v1, %v78_v0  ;;  %v81_v4 = vld [vmem:[#allocation5 + $0x18] sm:$0xff]  ;;  %v82_v6 = vld [vmem:[#allocation5 + $0x20] sm:$0xff] }
  0x38   :  { %v774_v5 = vpack.c.bf16 %v81_v4, %v80_v2  ;;  %v83_v7 = vld [vmem:[#allocation5 + $0x28] sm:$0xff]  ;;  %v62_v9 = vld [vmem:[#allocation2] sm:$0xff]  ;;  %v84_v10 = vld [vmem:[#allocation5 + $0x30] sm:$0xff] }
  0x39   :  { %771 = vmatprep.subr.bf16.mxu0 %v770_v3  ;;  %v778_v8 = vpack.c.bf16 %v83_v7, %v82_v6  ;;  %v85_v11 = vld [vmem:[#allocation5 + $0x38] sm:$0xff]  ;;  %690 = vmatprep.mubr.f32.mxu0 %v62_v9  ;;  %v86_v13 = vld [vmem:[#allocation5 + $0x40] sm:$0xff]  ;;  %v87_v14 = vld [vmem:[#allocation5 + $0x48] sm:$0xff] }
  0x3a   :  { %773 = vmatpush3.bf16.msra.mxu0 %v770_v3  ;;  %v782_v12 = vpack.c.bf16 %v85_v11, %v84_v10  ;;  %v390_v15 = vld [vmem:[#allocation7] sm:$0xff]  ;;  %v391_v16 = vld [vmem:[#allocation7 + $0x8] sm:$0xff]  ;;  %v786_v18 = vpack.c.bf16 %v87_v14, %v86_v13  ;;  %v88_v19 = vld [vmem:[#allocation5 + $0x50] sm:$0xff] }
  0x3b   :  { %775 = vmatprep.subr.bf16.mxu0 %v774_v5  ;;  %v802_v17 = vpack.c.bf16 %v391_v16, %v390_v15  ;;  %v89_v20 = vld [vmem:[#allocation5 + $0x58] sm:$0xff]  ;;  %v90_v22 = vld [vmem:[#allocation5 + $0x60] sm:$0xff]  ;;  %v91_v23 = vld [vmem:[#allocation5 + $0x68] sm:$0xff] }
  0x3c   :  { %v790_v21 = vpack.c.bf16 %v89_v20, %v88_v19  ;;  %v794_v24 = vpack.c.bf16 %v91_v23, %v90_v22  ;;  %v92_v25 = vld [vmem:[#allocation5 + $0x70] sm:$0xff]  ;;  %v93_v26 = vld [vmem:[#allocation5 + $0x78] sm:$0xff]  ;;  %v63_v28 = vld [vmem:[#allocation2 + $0x8] sm:$0xff] }
  0x3d   :  { %803 = vmatprep.subr.bf16.mxu1 %v802_v17  ;;  %v798_v27 = vpack.c.bf16 %v93_v26, %v92_v25  ;;  %v64_v29 = vld [vmem:[#allocation2 + $0x10] sm:$0xff]  ;;  %v65_v30 = vld [vmem:[#allocation2 + $0x18] sm:$0xff]  ;;  %v66_v31 = vld [vmem:[#allocation2 + $0x20] sm:$0xff] }
  0x3e   :  { %777 = vmatpush3.bf16.msra.mxu0 %v774_v5  ;;  %805 = vmatpush3.bf16.msra.mxu1 %v802_v17  ;;  %v67_v32 = vld [vmem:[#allocation2 + $0x28] sm:$0xff]  ;;  %v68_v33 = vld [vmem:[#allocation2 + $0x30] sm:$0xff]  ;;  %v69_v34 = vld [vmem:[#allocation2 + $0x38] sm:$0xff] }
  0x3f   :  { %779 = vmatprep.subr.bf16.mxu0 %v778_v8  ;;  %v70_v35 = vld [vmem:[#allocation2 + $0x40] sm:$0xff]  ;;  %v71_v36 = vld [vmem:[#allocation2 + $0x48] sm:$0xff]  ;;  %v72_v37 = vld [vmem:[#allocation2 + $0x50] sm:$0xff] }
  0x40   :  { %v73_v38 = vld [vmem:[#allocation2 + $0x58] sm:$0xff]  ;;  %v74_v39 = vld [vmem:[#allocation2 + $0x60] sm:$0xff]  ;;  %v75_v40 = vld [vmem:[#allocation2 + $0x68] sm:$0xff] }
  0x41   :  { %v76_v41 = vld [vmem:[#allocation2 + $0x70] sm:$0xff]  ;;  %v77_v42 = vld [vmem:[#allocation2 + $0x78] sm:$0xff]  ;;  %v394_v46 = vld [vmem:[#allocation7 + $0x20] sm:$0xff] }
  0x42   :  { %781 = vmatpush3.bf16.msra.mxu0 %v778_v8  ;;  %v392_v43 = vld [vmem:[#allocation7 + $0x10] sm:$0xff]  ;;  %v393_v44 = vld [vmem:[#allocation7 + $0x18] sm:$0xff]  ;;  %v395_v47 = vld [vmem:[#allocation7 + $0x28] sm:$0xff] }
  0x43   :  { %783 = vmatprep.subr.bf16.mxu0 %v782_v12  ;;  %v806_v45 = vpack.c.bf16 %v393_v44, %v392_v43  ;;  %v810_v48 = vpack.c.bf16 %v395_v47, %v394_v46  ;;  %v396_v49 = vld [vmem:[#allocation7 + $0x30] sm:$0xff]  ;;  %v397_v50 = vld [vmem:[#allocation7 + $0x38] sm:$0xff]  ;;  %v398_v52 = vld [vmem:[#allocation7 + $0x40] sm:$0xff] }
  0x44   :  { %v814_v51 = vpack.c.bf16 %v397_v50, %v396_v49  ;;  %v399_v53 = vld [vmem:[#allocation7 + $0x48] sm:$0xff]  ;;  %v400_v55 = vld [vmem:[#allocation7 + $0x50] sm:$0xff]  ;;  %v401_v56 = vld [vmem:[#allocation7 + $0x58] sm:$0xff] }
  0x45   :  { %807 = vmatprep.subr.bf16.mxu1 %v806_v45  ;;  %v818_v54 = vpack.c.bf16 %v399_v53, %v398_v52  ;;  %v822_v57 = vpack.c.bf16 %v401_v56, %v400_v55  ;;  %v402_v58 = vld [vmem:[#allocation7 + $0x60] sm:$0xff]  ;;  %v403_v59 = vld [vmem:[#allocation7 + $0x68] sm:$0xff]  ;;  %v404_v61 = vld [vmem:[#allocation7 + $0x70] sm:$0xff] }
  0x46   :  { %785 = vmatpush3.bf16.msra.mxu0 %v782_v12  ;;  %809 = vmatpush3.bf16.msra.mxu1 %v806_v45  ;;  %v826_v60 = vpack.c.bf16 %v403_v59, %v402_v58  ;;  %v405_v62 = vld [vmem:[#allocation7 + $0x78] sm:$0xff]  ;;  %v1057_v0 = vld [vmem:[%s1188_s2] ss:$0 sm:$0xff] }
  0x47   :  { %787 = vmatprep.subr.bf16.mxu0 %v786_v18  ;;  %811 = vmatprep.subr.bf16.mxu1 %v810_v48  ;;  %v830_v63 = vpack.c.bf16 %v405_v62, %v404_v61 }
  0x4a   :  { %789 = vmatpush3.bf16.msra.mxu0 %v786_v18  ;;  %813 = vmatpush3.bf16.msra.mxu1 %v810_v48 }
  0x4b   :  { %791 = vmatprep.subr.bf16.mxu0 %v790_v21  ;;  %815 = vmatprep.subr.bf16.mxu1 %v814_v51 }
  0x4e   :  { %793 = vmatpush3.bf16.msra.mxu0 %v790_v21  ;;  %817 = vmatpush3.bf16.msra.mxu1 %v814_v51 }
  0x4f   :  { %795 = vmatprep.subr.bf16.mxu0 %v794_v24  ;;  %819 = vmatprep.subr.bf16.mxu1 %v818_v54 }
  0x52   :  { %797 = vmatpush3.bf16.msra.mxu0 %v794_v24  ;;  %821 = vmatpush3.bf16.msra.mxu1 %v818_v54 }
  0x53   :  { %799 = vmatprep.subr.bf16.mxu0 %v798_v27  ;;  %823 = vmatprep.subr.bf16.mxu1 %v822_v57 }
  0x56   :  { %801 = vmatpush3.bf16.msra.mxu0 %v798_v27  ;;  %825 = vmatpush3.bf16.msra.mxu1 %v822_v57 }
  0x57   :  { %827 = vmatprep.subr.bf16.mxu1 %v826_v60 }
  0x59   :  { %691 = vmatmul.mubr.f32.vlgmr.msra.gmra.mrb[0].mxu0 %v63_v28 }
  0x5a   :  { %693 = vmatprep.mubr.f32.mxu0 %v64_v29  ;;  %829 = vmatpush3.bf16.msra.mxu1 %v826_v60 }
  0x5b   :  { %831 = vmatprep.subr.bf16.mxu1 %v830_v63 }
  0x5d   :  { %694 = vmatmul.mubr.f32.gmra.mrb[2].mxu0 %v65_v30 }
  0x5e   :  { %696 = vmatprep.mubr.f32.mxu0 %v66_v31  ;;  %833 = vmatpush3.bf16.msra.mxu1 %v830_v63 }
  0x61   :  { %697 = vmatmul.mubr.f32.gmra.mrb[4].mxu0 %v67_v32 }
  0x62   :  { %699 = vmatprep.mubr.f32.mxu0 %v68_v33 }
  0x65   :  { %700 = vmatmul.mubr.f32.gmra.mrb[6].mxu0 %v69_v34 }
  0x66   :  { %702 = vmatprep.mubr.f32.mxu0 %v70_v35 }
  0x69   :  { %703 = vmatmul.mubr.f32.gmra.mrb[8].mxu0 %v71_v36 }
  0x6a   :  { %705 = vmatprep.mubr.f32.mxu0 %v72_v37 }
  0x6d   :  { %706 = vmatmul.mubr.f32.gmra.mrb[10].mxu0 %v73_v38 }
  0x6e   :  { %708 = vmatprep.mubr.f32.mxu0 %v74_v39 }
  0x71   :  { %709 = vmatmul.mubr.f32.gmra.mrb[12].mxu0 %v75_v40 }
  0x72   :  { %711 = vmatprep.mubr.f32.mxu0 %v76_v41 }
  0x75   :  { %712 = vmatmul.mubr.f32.gmra.mrb[14].mxu0 %v77_v42 }
 0x12c   :  { %v692_v1 = vpop.f32.mrb[0].mxu0 }
 0x12d   :  { %v173_v2 = vadd.f32 %v692_v1, %v1057_v0  ;;  %v167_v3 = vpop.f32.mrb[1].mxu0 }
 0x12e   :  { %v1061_v4 = vadd.f32 %v1057_v0, %v167_v3 }
 0x12f   :  { %v263_v5 = vmul.f32 %v173_v2, %v173_v2  ;;  %v247_v19 = vmul.f32 0.7978846, %v173_v2  ;;  %v1106_v52 = vmul.f32 0.5, %v173_v2 }
 0x130   :  { %v262_v6 = vmul.f32 %v1061_v4, %v1061_v4  ;;  %v695_v7 = vpop.f32.mrb[2].mxu0  ;;  %v246_v15 = vmul.f32 0.7978846, %v1061_v4 }
 0x131   :  { %v279_v8 = vmul.f32 0.044715, %v263_v5  ;;  %v1066_v9 = vadd.f32 %v695_v7, %v1057_v0  ;;  %v177_v10 = vpop.f32.mrb[3].mxu0 }
 0x132   :  { %v278_v11 = vmul.f32 0.044715, %v262_v6  ;;  %v1069_v12 = vadd.f32 %v1057_v0, %v177_v10 }
 0x133   :  { %v295_v13 = vadd.f32 1.0, %v279_v8  ;;  %v265_v14 = vmul.f32 %v1066_v9, %v1066_v9  ;;  %v249_v35 = vmul.f32 0.7978846, %v1066_v9  ;;  %v326_v8 = vmul.f32 0.5, %v1061_v4 }
 0x134   :  { %v294_v16 = vadd.f32 1.0, %v278_v11  ;;  %v264_v17 = vmul.f32 %v1069_v12, %v1069_v12  ;;  %v698_v18 = vpop.f32.mrb[4].mxu0  ;;  %v248_v38 = vmul.f32 0.7978846, %v1069_v12 }
 0x135   :  { %v281_v20 = vmul.f32 0.044715, %v265_v14  ;;  %v1077_v21 = vadd.f32 %v698_v18, %v1057_v0  ;;  %v187_v22 = vpop.f32.mrb[5].mxu0  ;;  %v311_v26 = vmul.f32 %v295_v13, %v247_v19 }
 0x136   :  { %v280_v23 = vmul.f32 0.044715, %v264_v17  ;;  %v1080_v24 = vadd.f32 %v1057_v0, %v187_v22  ;;  %v310_v25 = vmul.f32 %v294_v16, %v246_v15 }
 0x137   :  { %v267_v27 = vmul.f32 %v1077_v21, %v1077_v21  ;;  %v297_v28 = vadd.f32 1.0, %v281_v20  ;;  %v251_v49 = vmul.f32 0.7978846, %v1077_v21 }
 0x138   :  { %v266_v29 = vmul.f32 %v1080_v24, %v1080_v24  ;;  %v701_v30 = vpop.f32.mrb[6].mxu0  ;;  %v296_v31 = vadd.f32 1.0, %v280_v23  ;;  %840 = vtanh.f32 %v310_v25  ;;  %v250_v45 = vmul.f32 0.7978846, %v1080_v24 }
 0x139   :  { %v283_v32 = vmul.f32 0.044715, %v267_v27  ;;  %v1087_v33 = vadd.f32 %v701_v30, %v1057_v0  ;;  %v197_v34 = vpop.f32.mrb[7].mxu0  ;;  %842 = vtanh.f32 %v311_v26  ;;  %v313_v40 = vmul.f32 %v297_v28, %v249_v35 }
 0x13a   :  { %v282_v36 = vmul.f32 0.044715, %v266_v29  ;;  %v1091_v37 = vadd.f32 %v1057_v0, %v197_v34  ;;  %v312_v44 = vmul.f32 %v296_v31, %v248_v38  ;;  %v329_v35 = vmul.f32 0.5, %v1066_v9 }
 0x13b   :  { %v269_v39 = vmul.f32 %v1087_v33, %v1087_v33  ;;  %v299_v41 = vadd.f32 1.0, %v283_v32  ;;  %844 = vtanh.f32 %v313_v40  ;;  %v253_v57 = vmul.f32 0.7978846, %v1087_v33 }
 0x13c   :  { %v298_v42 = vadd.f32 1.0, %v282_v36  ;;  %v704_v43 = vpop.f32.mrb[8].mxu0  ;;  %v268_v47 = vmul.f32 %v1091_v37, %v1091_v37  ;;  %846 = vtanh.f32 %v312_v44  ;;  %v252_v60 = vmul.f32 0.7978846, %v1091_v37 }
 0x13d   :  { %v285_v46 = vmul.f32 0.044715, %v269_v39  ;;  %v207_v48 = vpop.f32.mrb[9].mxu0  ;;  %v1101_v50 = vadd.f32 %v704_v43, %v1057_v0  ;;  %v315_v56 = vmul.f32 %v299_v41, %v251_v49  ;;  %v328_v41 = vmul.f32 0.5, %v1069_v12 }
 0x13e   :  { %v1104_v51 = vadd.f32 %v1057_v0, %v207_v48  ;;  %v314_v53 = vmul.f32 %v298_v42, %v250_v45  ;;  %v284_v55 = vmul.f32 0.044715, %v268_v47 }
 0x13f   :  { %v301_v54 = vadd.f32 1.0, %v285_v46  ;;  %v271_v58 = vmul.f32 %v1101_v50, %v1101_v50  ;;  %v255_v11 = vmul.f32 0.7978846, %v1101_v50 }
 0x140   :  { %v707_v59 = vpop.f32.mrb[10].mxu0  ;;  %v300_v61 = vadd.f32 1.0, %v284_v55  ;;  %v270_v62 = vmul.f32 %v1104_v51, %v1104_v51  ;;  %848 = vtanh.f32 %v314_v53  ;;  %v254_v17 = vmul.f32 0.7978846, %v1104_v51 }
 0x141   :  { %v217_v63 = vpop.f32.mrb[11].mxu0  ;;  %v317_v1 = vmul.f32 %v301_v54, %v253_v57  ;;  %v287_v2 = vmul.f32 0.044715, %v271_v58  ;;  %v1115_v3 = vadd.f32 %v707_v59, %v1057_v0  ;;  %850 = vtanh.f32 %v315_v56 }
 0x142   :  { %v1118_v5 = vadd.f32 %v1057_v0, %v217_v63  ;;  %v316_v6 = vmul.f32 %v300_v61, %v252_v60  ;;  %v286_v7 = vmul.f32 0.044715, %v270_v62  ;;  %v841_v10 = vpop.eup %840  ;;  %v330_v55 = vmul.f32 0.5, %v1080_v24 }
 0x143   :  { %v303_v13 = vadd.f32 1.0, %v287_v2  ;;  %v273_v14 = vmul.f32 %v1115_v3, %v1115_v3  ;;  %v843_v16 = vpop.eup %842  ;;  %v358_v28 = vadd.f32 1.0, %v841_v10  ;;  %v257_v29 = vmul.f32 0.7978846, %v1115_v3 }
 0x144   :  { %v710_v15 = vpop.f32.mrb[12].mxu0  ;;  %852 = vtanh.f32 %v316_v6  ;;  %v302_v18 = vadd.f32 1.0, %v286_v7  ;;  %v272_v19 = vmul.f32 %v1118_v5, %v1118_v5  ;;  %v359_v34 = vadd.f32 1.0, %v843_v16 }
 0x145   :  { %v227_v20 = vpop.f32.mrb[13].mxu0  ;;  %854 = vtanh.f32 %v317_v1  ;;  %v319_v4 = vmul.f32 %v303_v13, %v255_v11  ;;  %v289_v22 = vmul.f32 0.044715, %v273_v14  ;;  %v1128_v23 = vadd.f32 %v710_v15, %v1057_v0  ;;  %v845_v40 = vpop.eup %844 }
 0x146   :  { %v318_v25 = vmul.f32 %v302_v18, %v254_v17  ;;  %v288_v26 = vmul.f32 0.044715, %v272_v19  ;;  %v1131_v27 = vadd.f32 %v1057_v0, %v227_v20  ;;  %v256_v36 = vmul.f32 0.7978846, %v1118_v5  ;;  %v847_v45 = vpop.eup %846 }
 0x147   :  { %v305_v30 = vadd.f32 1.0, %v289_v22  ;;  %v275_v31 = vmul.f32 %v1128_v23, %v1128_v23  ;;  %v374_v47 = vmul.f32 %v358_v28, %v326_v8  ;;  %v375_v53 = vmul.f32 %v359_v34, %v1106_v52 }
 0x148   :  { %v713_v32 = vpop.f32.mrb[14].mxu0  ;;  %856 = vtanh.f32 %v318_v25  ;;  %v304_v38 = vadd.f32 1.0, %v288_v26  ;;  %v274_v44 = vmul.f32 %v1131_v27, %v1131_v27  ;;  %v259_v56 = vmul.f32 0.7978846, %v1128_v23 }
 0x149   :  { %v237_v39 = vpop.f32.mrb[15].mxu0  ;;  %v321_v42 = vmul.f32 %v305_v30, %v257_v29  ;;  %v291_v43 = vmul.f32 0.044715, %v275_v31  ;;  %858 = vtanh.f32 %v319_v4  ;;  %v1142_v48 = vadd.f32 %v713_v32, %v1057_v0  ;;  %746 = vmatprep.mubr.f32.mxu1 %v374_v47 }
 0x14a   :  { %v320_v46 = vmul.f32 %v304_v38, %v256_v36  ;;  %v290_v49 = vmul.f32 0.044715, %v274_v44  ;;  %v1146_v54 = vadd.f32 %v1057_v0, %v237_v39  ;;  %v849_v12 = vpop.eup %848  ;;  %v258_v59 = vmul.f32 0.7978846, %v1131_v27  ;;  %747 = vmatmul.mubr.f32.vlgmr.msra.gmra.mrb[0].mxu1 %v375_v53 }
 0x14b   :  { %v307_v9 = vadd.f32 1.0, %v291_v43  ;;  %v277_v57 = vmul.f32 %v1142_v48, %v1142_v48  ;;  %v851_v58 = vpop.eup %850  ;;  %v360_v24 = vadd.f32 1.0, %v847_v45  ;;  %v361_v63 = vadd.f32 1.0, %v845_v40 }
 0x14c   :  { %860 = vtanh.f32 %v320_v46  ;;  %v306_v60 = vadd.f32 1.0, %v290_v49  ;;  %v276_v0 = vmul.f32 %v1146_v54, %v1146_v54  ;;  %v260_v6 = vmul.f32 0.7978846, %v1146_v54 }
 0x14d   :  { %862 = vtanh.f32 %v321_v42  ;;  %v323_v61 = vmul.f32 %v307_v9, %v259_v56  ;;  %v293_v62 = vmul.f32 0.044715, %v277_v57  ;;  %v362_v8 = vadd.f32 1.0, %v849_v12 }
 0x14e   :  { %v853_v52 = vpop.eup %852  ;;  %v322_v2 = vmul.f32 %v306_v60, %v258_v59  ;;  %v292_v7 = vmul.f32 0.044715, %v276_v0  ;;  %v376_v11 = vmul.f32 %v360_v24, %v328_v41  ;;  %v377_v13 = vmul.f32 %v361_v63, %v329_v35  ;;  %v593_v60 = vld [vmem:[%s1190_s4] ss:$0 sm:$0xff]  ;;  %s971_s4 = smov [#allocation8]  }
 0x14f   :  { %v855_v1 = vpop.eup %854  ;;  %v309_v10 = vadd.f32 1.0, %v293_v62  ;;  %v363_v14 = vadd.f32 1.0, %v851_v58  ;;  %v378_v16 = vmul.f32 %v362_v8, %v330_v55  ;;  %v364_v17 = vadd.f32 1.0, %v853_v52  ;;  %s579_s8 = sshll.u32 %s971_s4, 4  ;;  %s580_s8 = int_to_ptr.vmem [resolvable:$true] %s579_s8 }
 0x150   :  { %864 = vtanh.f32 %v322_v2  ;;  %v308_v15 = vadd.f32 1.0, %v292_v7  ;;  %v332_v19 = vmul.f32 0.5, %v1091_v37  ;;  %v261_v20 = vmul.f32 0.7978846, %v1142_v48  ;;  %749 = vmatprep.mubr.f32.mxu1 %v376_v11  ;;  %s938_s9 = scalar_lea.vmem %s580_s8, 2048  ;;  %p943_p11 = scmp.lt.s32.totalorder %s580_s8, %s580_s8 }
 0x151   :  { %v331_v4 = vmul.f32 0.5, %v1077_v21  ;;  %750 = vmatmul.mubr.f32.gmra.mrb[2].mxu1 %v377_v13  ;;  %866 = vtanh.f32 %v323_v61  ;;  %v365_v31 = vadd.f32 1.0, %v855_v1  ;;  %v334_v34 = vmul.f32 0.5, %v1104_v51  ;;  %p939_p10 = scmp.ne.s32.totalorder %s580_s8, %s938_s9  ;;  %p944_p12 = scmp.lt.s32.totalorder %s938_s9, %s938_s9 }
 0x152   :  { %v857_v18 = vpop.eup %856  ;;  %v324_v22 = vmul.f32 %v308_v15, %v260_v6  ;;  %v325_v26 = vmul.f32 %v309_v10, %v261_v20  ;;  %752 = vmatprep.mubr.f32.mxu1 %v378_v16  ;;  %v380_v28 = vmul.f32 %v364_v17, %v332_v19  ;;  %v333_v35 = vmul.f32 0.5, %v1087_v33 }
 0x153   :  { %v859_v25 = vpop.eup %858  ;;  %v366_v29 = vadd.f32 1.0, %v857_v18  ;;  %v379_v30 = vmul.f32 %v363_v14, %v331_v4  ;;  %v336_v40 = vmul.f32 0.5, %v1118_v5  ;;  %v335_v42 = vmul.f32 0.5, %v1101_v50  ;;  %p945_p13 = por %p944_p12, %p943_p11 }
 0x154   :  { %868 = vtanh.f32 %v324_v22  ;;  %v381_v38 = vmul.f32 %v365_v31, %v333_v35  ;;  %v367_v39 = vadd.f32 1.0, %v859_v25  ;;  %v338_v33 = vmul.f32 0.5, %v1131_v27 }
 0x155   :  { %753 = vmatmul.mubr.f32.gmra.mrb[4].mxu1 %v379_v30  ;;  %870 = vtanh.f32 %v325_v26  ;;  %v382_v21 = vmul.f32 %v366_v29, %v334_v34  ;;  %v337_v9 = vmul.f32 0.5, %v1115_v3  ;;  %v340_v50 = vmul.f32 0.5, %v1146_v54  ;;  %p946_p0 = pnand %p945_p13, %p939_p10 }
 0x156   :  { %v861_v32 = vpop.eup %860  ;;  %755 = vmatprep.mubr.f32.mxu1 %v380_v28  ;;  %v383_v51 = vmul.f32 %v367_v39, %v335_v42  ;;  %v339_v56 = vmul.f32 0.5, %v1128_v23  ;;  %v341_v27 = vmul.f32 0.5, %v1142_v48 }
 0x157   :  { %v863_v37 = vpop.eup %862  ;;  %v368_v36 = vadd.f32 1.0, %v861_v32 }
 0x158   :  { %v369_v45 = vadd.f32 1.0, %v863_v37 }
 0x159   :  { %756 = vmatmul.mubr.f32.gmra.mrb[6].mxu1 %v381_v38  ;;  %v384_v43 = vmul.f32 %v368_v36, %v336_v40 }
 0x15a   :  { %v865_v41 = vpop.eup %864  ;;  %758 = vmatprep.mubr.f32.mxu1 %v382_v21  ;;  %v385_v5 = vmul.f32 %v369_v45, %v337_v9 }
 0x15b   :  { %v370_v44 = vadd.f32 1.0, %v865_v41  ;;  %v867_v46 = vpop.eup %866 }
 0x15c   :  { %v371_v12 = vadd.f32 1.0, %v867_v46 }
 0x15d   :  { %759 = vmatmul.mubr.f32.gmra.mrb[8].mxu1 %v383_v51  ;;  %v386_v49 = vmul.f32 %v370_v44, %v338_v33 }
 0x15e   :  { %v869_v47 = vpop.eup %868  ;;  %761 = vmatprep.mubr.f32.mxu1 %v384_v43  ;;  %v387_v58 = vmul.f32 %v371_v12, %v339_v56 }
 0x15f   :  { %v372_v53 = vadd.f32 1.0, %v869_v47  ;;  %v871_v55 = vpop.eup %870 }
 0x160   :  { %v373_v59 = vadd.f32 1.0, %v871_v55 }
 0x161   :  { %762 = vmatmul.mubr.f32.gmra.mrb[10].mxu1 %v385_v5  ;;  %v388_v57 = vmul.f32 %v372_v53, %v340_v50 }
 0x162   :  { %764 = vmatprep.mubr.f32.mxu1 %v386_v49  ;;  %v389_v3 = vmul.f32 %v373_v59, %v341_v27 }
 0x165   :  { %765 = vmatmul.mubr.f32.gmra.mrb[12].mxu1 %v387_v58 }
 0x166   :  { %767 = vmatprep.mubr.f32.mxu1 %v388_v57 }
 0x169   :  { %768 = vmatmul.mubr.f32.gmra.mrb[14].mxu1 %v389_v3 }
 0x21d   :  { %v748_v0 = vpop.f32.mrb[0].mxu1 }
 0x21e   :  { %v485_v52 = vadd.f32 %v748_v0, %v593_v60  ;;  %v479_v54 = vpop.f32.mrb[1].mxu1 }
 0x21f   :  { %v480_v61 = vadd.f32 %v593_v60, %v479_v54 }
 0x220   :  { %559 = vst [vmem:[#allocation8 + $0x8] sm:$0xff] %v485_v52 }
 0x221   :  { %558 = vst [vmem:[#allocation8] sm:$0xff] %v480_v61 }
 0x224   :  { %v751_v23 = vpop.f32.mrb[2].mxu1 }
 0x225   :  { %v495_v62 = vadd.f32 %v751_v23, %v593_v60  ;;  %v489_v24 = vpop.f32.mrb[3].mxu1 }
 0x226   :  { %v490_v63 = vadd.f32 %v593_v60, %v489_v24 }
 0x227   :  { %561 = vst [vmem:[#allocation8 + $0x18] sm:$0xff] %v495_v62 }
 0x228   :  { %560 = vst [vmem:[#allocation8 + $0x10] sm:$0xff] %v490_v63  ;;  %v754_v48 = vpop.f32.mrb[4].mxu1 }
 0x229   :  { %v505_v1 = vadd.f32 %v754_v48, %v593_v60  ;;  %v499_v2 = vpop.f32.mrb[5].mxu1 }
 0x22a   :  { %v500_v6 = vadd.f32 %v593_v60, %v499_v2 }
 0x22b   :  { %563 = vst [vmem:[#allocation8 + $0x28] sm:$0xff] %v505_v1 }
 0x22c   :  { %562 = vst [vmem:[#allocation8 + $0x20] sm:$0xff] %v500_v6  ;;  %v757_v7 = vpop.f32.mrb[6].mxu1 }
 0x22d   :  { %v515_v8 = vadd.f32 %v757_v7, %v593_v60  ;;  %v509_v10 = vpop.f32.mrb[7].mxu1 }
 0x22e   :  { %v510_v11 = vadd.f32 %v593_v60, %v509_v10 }
 0x22f   :  { %565 = vst [vmem:[#allocation8 + $0x38] sm:$0xff] %v515_v8 }
 0x230   :  { %564 = vst [vmem:[#allocation8 + $0x30] sm:$0xff] %v510_v11  ;;  %v760_v13 = vpop.f32.mrb[8].mxu1 }
 0x231   :  { %v525_v14 = vadd.f32 %v760_v13, %v593_v60  ;;  %v519_v15 = vpop.f32.mrb[9].mxu1 }
 0x232   :  { %v520_v16 = vadd.f32 %v593_v60, %v519_v15 }
 0x233   :  { %567 = vst [vmem:[#allocation8 + $0x48] sm:$0xff] %v525_v14 }
 0x234   :  { %566 = vst [vmem:[#allocation8 + $0x40] sm:$0xff] %v520_v16  ;;  %v763_v17 = vpop.f32.mrb[10].mxu1 }
 0x235   :  { %v535_v18 = vadd.f32 %v763_v17, %v593_v60  ;;  %v529_v19 = vpop.f32.mrb[11].mxu1 }
 0x236   :  { %v530_v20 = vadd.f32 %v593_v60, %v529_v19 }
 0x237   :  { %569 = vst [vmem:[#allocation8 + $0x58] sm:$0xff] %v535_v18 }
 0x238   :  { %568 = vst [vmem:[#allocation8 + $0x50] sm:$0xff] %v530_v20  ;;  %v766_v4 = vpop.f32.mrb[12].mxu1 }
 0x239   :  { %v545_v22 = vadd.f32 %v766_v4, %v593_v60  ;;  %v539_v25 = vpop.f32.mrb[13].mxu1 }
 0x23a   :  { %v540_v26 = vadd.f32 %v593_v60, %v539_v25 }
 0x23b   :  { %571 = vst [vmem:[#allocation8 + $0x68] sm:$0xff] %v545_v22 }
 0x23c   :  { %570 = vst [vmem:[#allocation8 + $0x60] sm:$0xff] %v540_v26  ;;  %v769_v28 = vpop.f32.mrb[14].mxu1 }
 0x23d   :  { %v555_v29 = vadd.f32 %v769_v28, %v593_v60  ;;  %v549_v30 = vpop.f32.mrb[15].mxu1 }
 0x23e   :  { %v550_v31 = vadd.f32 %v593_v60, %v549_v30 }
 0x23f   :  { %573 = vst [vmem:[#allocation8 + $0x78] sm:$0xff] %v555_v29 }
 0x240   :  { %572 = vst [vmem:[#allocation8 + $0x70] sm:$0xff] %v550_v31 }
 0x241   :  { %949 = shalt.err (!%p946_p0)
}
 0x242   :  { %s950_s12 = scalar_lea.hbm %s1191_s5, 2048 }
 0x243   :  { %p951_p1 = scmp.ne.s32.totalorder %s1191_s5, %s950_s12  ;;  %p954_p2 = scmp.lt.u32.totalorder %s950_s12, %s1191_s5 }
 0x245   :  { %p956_p3 = pnand %p954_p2, %p951_p1 }
 0x247   :  { %959 = shalt.err (!%p956_p3)
}
 0x248   :  { %585 = dma.vmem_to_hbm [thread:$0]  %s580_s8, 2048, %s1191_s5, [#allocation4], %s968_s30, %s968_s30, %s969_s6  }
 0x249   :  { %964 = dma.done.wait [#allocation4], 2048  }
 0x24a   :  { %965 = vsyncadd [#allocation4], 4294965248 }
 0x24b   :  { %589 = vsyncpa [#allocation3], 1 }
 0x24c   :  { %590 = vsyncpa [#allocation6], 1 }
 0x24d   :  { %591 = vsyncpa [#allocation4], 1 }

</bundles_post_ra>
